<compile_context>
chip_gen: v7x
topology: tpu7x:2x2x1
jax: 0.10.0
libtpu: 0.0.40
codegen_flags: <defaults>
</compile_context>

<pallas_src>
import math

import jax
import jax.numpy as jnp
from jax.experimental import pallas as pl
from jax.experimental.pallas import tpu as pltpu


def _round_up(x, m):
    return (x + m - 1) // m * m


def _ffn_kernel(x_ref, w1_ref, b1_ref, w2_ref, b2_ref, o_ref, acc_ref):
    # x_ref:   (tm, dim_p)   input tile, original dtype (cast to bf16 here)
    # w1_ref:  (dim_p, tk)   bf16 W1 hidden-slice
    # b1_ref:  (1, tk)       f32 bias slice
    # w2_ref:  (tk, dim_p)   bf16 W2 hidden-slice
    # b2_ref:  (1, dim_p)    f32 bias
    # o_ref:   (tm, dim_p)   output tile (written at last hidden step)
    # acc_ref: (tm, dim_p)   f32 accumulator scratch, lives across the k axis
    k = pl.program_id(1)

    @pl.when(k == 0)
    def _():
        acc_ref[...] = jnp.zeros_like(acc_ref)

    x = x_ref[...].astype(jnp.bfloat16)                        # VPU cast (free slot)
    h = jnp.dot(x, w1_ref[...], preferred_element_type=jnp.float32)
    h = jnp.maximum(h + b1_ref[...], 0.0)                      # bias + ReLU in f32
    acc_ref[...] += jnp.dot(h.astype(jnp.bfloat16), w2_ref[...],
                            preferred_element_type=jnp.float32)

    @pl.when(k == pl.num_programs(1) - 1)
    def _():
        o_ref[...] = (acc_ref[...] + b2_ref[...]).astype(o_ref.dtype)


def prepare_params(w1, b1, w2, b2):
    """Pad feature dims to multiples of 128 and cast weights to bf16 — ONCE.

    Call at model load / param init time, not per forward call.
    w1: (dim, hidden), b1: (hidden,), w2: (hidden, dim), b2: (dim,).
    """
    dim, hidden = w1.shape
    dim_p = _round_up(dim, 128)
    hid_p = _round_up(hidden, 128)
    w1_p = jnp.zeros((dim_p, hid_p), jnp.bfloat16).at[:dim, :hidden].set(
        w1.astype(jnp.bfloat16))
    w2_p = jnp.zeros((hid_p, dim_p), jnp.bfloat16).at[:hidden, :dim].set(
        w2.astype(jnp.bfloat16))
    b1_p = jnp.zeros((1, hid_p), jnp.float32).at[0, :hidden].set(
        b1.astype(jnp.float32))
    b2_p = jnp.zeros((1, dim_p), jnp.float32).at[0, :dim].set(
        b2.astype(jnp.float32))
    return {"w1": w1_p, "b1": b1_p, "w2": w2_p, "b2": b2_p,
            "dim": dim, "hidden": hidden}


def feed_forward(x, params, *, tm=512, tk=512):
    """Fused FFN: relu(x @ w1 + b1) @ w2 + b2 (eval-mode dropout == identity).

    x: (B, S, dim); params: output of prepare_params().
    """
    w1_p, b1_p = params["w1"], params["b1"]
    w2_p, b2_p = params["w2"], params["b2"]
    dim = params["dim"]
    dim_p, hid_p = w1_p.shape
    B, S, _ = x.shape
    rows = B * S
    out_dtype = x.dtype
    x_bpe = jnp.dtype(x.dtype).itemsize
    out_bpe = jnp.dtype(out_dtype).itemsize

    # ---- Row tile (tm): leading "parallel" axis.  Guarantee >=2 row tiles
    # when rows allow so both v7x TensorCores get work.
    rows8 = _round_up(rows, 8)
    tm = min(_round_up(tm, 8), rows8)
    if rows8 >= 256 and rows8 < 2 * tm:
        tm = _round_up(-(-rows8 // 2), 8)
    tm = max(8, tm)

    # ---- Hidden tile (tk): trailing "arbitrary" reduction axis; a multiple
    # of 128 that divides hid_p (hid_p is always a multiple of 128).
    tk = min(_round_up(tk, 128), hid_p)
    while hid_p % tk != 0:
        tk -= 128

    # ---- VMEM budget clamped to the real device capacity (v7x: 64 MiB/TC).
    try:
        vmem_cap = int(getattr(pltpu.get_tpu_info(), "vmem_capacity_bytes",
                               64 * 1024 * 1024))
    except Exception:
        vmem_cap = 64 * 1024 * 1024
    usable = max(vmem_cap - 8 * 1024 * 1024, 16 * 1024 * 1024)

    def budget(tm_, tk_):
        return (2 * tm_ * dim_p * x_bpe          # x tile (double-buffered)
                + 2 * dim_p * tk_ * 2            # W1 slice (double-buffered)
                + 2 * tk_ * dim_p * 2            # W2 slice (double-buffered)
                + 2 * (tk_ + dim_p) * 4          # biases
                + 2 * tm_ * dim_p * out_bpe      # out tile (double-buffered)
                + tm_ * dim_p * 4                # f32 accumulator scratch
                + tm_ * tk_ * 6)                 # transient h (f32 + bf16 cast)

    while budget(tm, tk) > usable and tk > 128:  # shrink hidden tile first
        tk = max(128, (tk // 2) // 128 * 128)
        while hid_p % tk != 0:
            tk -= 128
    while budget(tm, tk) > usable and tm > 8:    # then the row tile
        tm = max(8, _round_up(tm // 2, 8))

    rows_p = _round_up(rows, tm)
    grid_m = rows_p // tm
    grid_k = hid_p // tk

    # ---- x: no wrapper-side pad/cast pass when shapes already line up
    # (reshape is free metadata); bf16 cast happens inside the kernel.
    x2d = x.reshape(rows, dim)
    if rows_p != rows or dim_p != dim:
        x2d = jnp.zeros((rows_p, dim_p), x.dtype).at[:rows, :dim].set(x2d)

    vmem_limit = int(min(usable, max(2 * budget(tm, tk), 32 * 1024 * 1024)))

    cost = pl.CostEstimate(
        flops=4 * rows_p * dim_p * hid_p,             # two matmuls, 2*M*N*K each
        transcendentals=0,
        bytes_accessed=(rows_p * dim_p * x_bpe        # x
                        + 2 * dim_p * hid_p * 2       # W1 + W2 (bf16)
                        + (hid_p + dim_p) * 4         # biases
                        + rows_p * dim_p * out_bpe))  # y

    out2d = pl.pallas_call(
        _ffn_kernel,
        out_shape=jax.ShapeDtypeStruct((rows_p, dim_p), out_dtype),
        grid_spec=pltpu.PrefetchScalarGridSpec(
            num_scalar_prefetch=0,
            grid=(grid_m, grid_k),
            in_specs=[
                pl.BlockSpec((tm, dim_p), lambda i, k: (i, 0)),   # x (k-invariant)
                pl.BlockSpec((dim_p, tk), lambda i, k: (0, k)),   # W1 slice
                pl.BlockSpec((1, tk),     lambda i, k: (0, k)),   # b1 slice
                pl.BlockSpec((tk, dim_p), lambda i, k: (k, 0)),   # W2 slice
                pl.BlockSpec((1, dim_p),  lambda i, k: (0, 0)),   # b2
            ],
            out_specs=pl.BlockSpec((tm, dim_p), lambda i, k: (i, 0)),
            scratch_shapes=[pltpu.VMEM((tm, dim_p), jnp.float32)],
        ),
        compiler_params=pltpu.CompilerParams(
            dimension_semantics=("parallel", "arbitrary"),
            vmem_limit_bytes=vmem_limit),
        cost_estimate=cost,
    )(x2d, w1_p, b1_p, w2_p, b2_p)

    if rows_p != rows or dim_p != dim:
        out2d = out2d[:rows, :dim]
    return out2d.reshape(B, S, dim)


def init_params(key, dim, hidden_dim, dtype=jnp.float32):
    """Deterministic init mimicking nn.Linear's uniform(-1/sqrt(fan_in), 1/sqrt(fan_in))."""
    k1, k2, k3, k4 = jax.random.split(key, 4)
    bound1 = 1.0 / math.sqrt(dim)
    bound2 = 1.0 / math.sqrt(hidden_dim)
    # Stored as (in, out) = transpose of PyTorch's (out, in) weight.
    w1 = jax.random.uniform(k1, (dim, hidden_dim), dtype, -bound1, bound1)
    b1 = jax.random.uniform(k2, (hidden_dim,), dtype, -bound1, bound1)
    w2 = jax.random.uniform(k3, (hidden_dim, dim), dtype, -bound2, bound2)
    b2 = jax.random.uniform(k4, (dim,), dtype, -bound2, bound2)
    return w1, b1, w2, b2


if __name__ == "__main__":
    key = jax.random.PRNGKey(0)
    B, S, DIM, HIDDEN = 2, 8, 32, 64   # small ModelConfig: dim=32, hidden_dim=64

    kx, kp = jax.random.split(key)
    x = jax.random.normal(kx, (B, S, DIM), jnp.float32)
    w1, b1, w2, b2 = init_params(kp, DIM, HIDDEN)

    params = prepare_params(w1, b1, w2, b2)     # once, outside the hot path
    out = feed_forward(x, params)
    out = jax.block_until_ready(out)
    assert out.shape == (B, S, DIM)

    # Reference 1: emulate the kernel's bf16-operand / f32-accumulate matmuls.
    xb = x.astype(jnp.bfloat16).astype(jnp.float32)
    w1b = w1.astype(jnp.bfloat16).astype(jnp.float32)
    w2b = w2.astype(jnp.bfloat16).astype(jnp.float32)
    h_ref = jnp.maximum(xb @ w1b + b1, 0.0)
    ref_bf16 = h_ref.astype(jnp.bfloat16).astype(jnp.float32) @ w2b + b2
    assert jnp.allclose(out, ref_bf16, atol=2e-3, rtol=2e-3), "mismatch vs bf16 reference"

    # Reference 2: full-f32 PyTorch semantics (looser tolerance, bf16 matmuls).
    ref_f32 = jnp.maximum(x @ w1 + b1, 0.0) @ w2 + b2
    assert jnp.allclose(out, ref_f32, atol=5e-2, rtol=5e-2), "mismatch vs f32 reference"

    print("KERNEL_OK")
</pallas_src>

<mosaic_0001>
module attributes {stable_mosaic.version = 11 : i64} {
  func.func @_ffn_kernel(%arg0: i32, %arg1: i32, %arg2: memref<16x128xf32, #tpu.memory_space<vmem>>, %arg3: memref<128x128xbf16, #tpu.memory_space<vmem>>, %arg4: memref<1x128xf32, #tpu.memory_space<vmem>>, %arg5: memref<128x128xbf16, #tpu.memory_space<vmem>>, %arg6: memref<1x128xf32, #tpu.memory_space<vmem>>, %arg7: memref<16x128xf32, #tpu.memory_space<vmem>>, %arg8: memref<16x128xf32, #tpu.memory_space<vmem>>) attributes {dimension_semantics = [#tpu.dimension_semantics<parallel>, #tpu.dimension_semantics<arbitrary>], iteration_bounds = array<i64: 1, 1>, scalar_prefetch = 0 : i64, scratch_operands = 1 : i64, tpu.core_type = #tpu.core_type<tc>, window_params = [{transform_indices = @transform_0, window_bounds = array<i64: 16, 128>}, {transform_indices = @transform_1, window_bounds = array<i64: 128, 128>}, {transform_indices = @transform_2, window_bounds = array<i64: 1, 128>}, {transform_indices = @transform_3, window_bounds = array<i64: 128, 128>}, {pipeline_mode = #tpu.pipeline_mode<synchronous>, transform_indices = @transform_4, window_bounds = array<i64: 1, 128>}, {transform_indices = @transform_5, window_bounds = array<i64: 16, 128>}]} {
    %c0_i32 = arith.constant 0 : i32
    %0 = arith.cmpi eq, %arg1, %c0_i32 : i32
    %1 = arith.extui %0 : i1 to i32
    %c0_i32_0 = arith.constant 0 : i32
    %2 = arith.cmpi ne, %1, %c0_i32_0 : i32
    scf.if %2 {
      %cst_16 = arith.constant 0.000000e+00 : f32
      %21 = vector.broadcast %cst_16 : f32 to vector<16x128xf32>
      %c0_17 = arith.constant 0 : index
      %c0_18 = arith.constant 0 : index
      %22 = vector.load %arg8[%c0_17, %c0_18] : memref<16x128xf32, #tpu.memory_space<vmem>>, vector<16x128xf32>
      tpu.vector_store %arg8[%c0_17, %c0_18], %21 {strides = array<i32>} : memref<16x128xf32, #tpu.memory_space<vmem>>, vector<16x128xf32>,
    } else {
    }
    %c0 = arith.constant 0 : index
    %c0_1 = arith.constant 0 : index
    %3 = vector.load %arg2[%c0, %c0_1] : memref<16x128xf32, #tpu.memory_space<vmem>>, vector<16x128xf32>
    %4 = arith.truncf %3 : vector<16x128xf32> to vector<16x128xbf16>
    %c0_2 = arith.constant 0 : index
    %c0_3 = arith.constant 0 : index
    %5 = vector.load %arg3[%c0_2, %c0_3] : memref<128x128xbf16, #tpu.memory_space<vmem>>, vector<128x128xbf16>
    %cst = arith.constant dense<0.000000e+00> : vector<16x128xf32>
    %6 = tpu.matmul %4, %5, %cst {dimension_numbers = #tpu.dot_dimension_numbers<[1], [0], [0], [1], [0, 0, 1, 1], [], []>} : vector<16x128xbf16>, vector<128x128xbf16>, vector<16x128xf32> -> vector<16x128xf32>
    %c0_4 = arith.constant 0 : index
    %c0_5 = arith.constant 0 : index
    %7 = vector.load %arg4[%c0_4, %c0_5] : memref<1x128xf32, #tpu.memory_space<vmem>>, vector<1x128xf32>
    %8 = vector.broadcast %7 : vector<1x128xf32> to vector<16x128xf32>
    %9 = arith.addf %6, %8 : vector<16x128xf32>
    %cst_6 = arith.constant 0.000000e+00 : f32
    %10 = vector.broadcast %cst_6 : f32 to vector<16x128xf32>
    %11 = arith.maximumf %9, %10 : vector<16x128xf32>
    %c0_7 = arith.constant 0 : index
    %c0_8 = arith.constant 0 : index
    %12 = vector.load %arg8[%c0_7, %c0_8] : memref<16x128xf32, #tpu.memory_space<vmem>>, vector<16x128xf32>
    %13 = arith.truncf %11 : vector<16x128xf32> to vector<16x128xbf16>
    %c0_9 = arith.constant 0 : index
    %c0_10 = arith.constant 0 : index
    %14 = vector.load %arg5[%c0_9, %c0_10] : memref<128x128xbf16, #tpu.memory_space<vmem>>, vector<128x128xbf16>
    %cst_11 = arith.constant dense<0.000000e+00> : vector<16x128xf32>
    %15 = tpu.matmul %13, %14, %cst_11 {dimension_numbers = #tpu.dot_dimension_numbers<[1], [0], [0], [1], [0, 0, 1, 1], [], []>} : vector<16x128xbf16>, vector<128x128xbf16>, vector<16x128xf32> -> vector<16x128xf32>
    %16 = arith.addf %12, %15 : vector<16x128xf32>
    %c0_12 = arith.constant 0 : index
    %c0_13 = arith.constant 0 : index
    %17 = vector.load %arg8[%c0_12, %c0_13] : memref<16x128xf32, #tpu.memory_space<vmem>>, vector<16x128xf32>
    tpu.vector_store %arg8[%c0_12, %c0_13], %16 {strides = array<i32>} : memref<16x128xf32, #tpu.memory_space<vmem>>, vector<16x128xf32>,
    %c0_i32_14 = arith.constant 0 : i32
    %18 = arith.cmpi eq, %arg1, %c0_i32_14 : i32
    %19 = arith.extui %18 : i1 to i32
    %c0_i32_15 = arith.constant 0 : i32
    %20 = arith.cmpi ne, %19, %c0_i32_15 : i32
    scf.if %20 {
      %c0_16 = arith.constant 0 : index
      %c0_17 = arith.constant 0 : index
      %21 = vector.load %arg8[%c0_16, %c0_17] : memref<16x128xf32, #tpu.memory_space<vmem>>, vector<16x128xf32>
      %c0_18 = arith.constant 0 : index
      %c0_19 = arith.constant 0 : index
      %22 = vector.load %arg6[%c0_18, %c0_19] : memref<1x128xf32, #tpu.memory_space<vmem>>, vector<1x128xf32>
      %23 = vector.broadcast %22 : vector<1x128xf32> to vector<16x128xf32>
      %24 = arith.addf %21, %23 : vector<16x128xf32>
      %c0_20 = arith.constant 0 : index
      %c0_21 = arith.constant 0 : index
      %25 = vector.load %arg7[%c0_20, %c0_21] : memref<16x128xf32, #tpu.memory_space<vmem>>, vector<16x128xf32>
      tpu.vector_store %arg7[%c0_20, %c0_21], %24 {strides = array<i32>} : memref<16x128xf32, #tpu.memory_space<vmem>>, vector<16x128xf32>,
    } else {
    }
    return
  }
  func.func @transform_0(%arg0: i32, %arg1: i32) -> (i32, i32) {
    %c0_i32 = arith.constant 0 : i32
    %c0_i32_0 = arith.constant 0 : i32
    return %arg0, %c0_i32 : i32, i32
  }
  func.func @transform_1(%arg0: i32, %arg1: i32) -> (i32, i32) {
    %c0_i32 = arith.constant 0 : i32
    %c0_i32_0 = arith.constant 0 : i32
    return %c0_i32, %arg1 : i32, i32
  }
  func.func @transform_2(%arg0: i32, %arg1: i32) -> (i32, i32) {
    %c0_i32 = arith.constant 0 : i32
    %c0_i32_0 = arith.constant 0 : i32
    return %c0_i32, %arg1 : i32, i32
  }
  func.func @transform_3(%arg0: i32, %arg1: i32) -> (i32, i32) {
    %c0_i32 = arith.constant 0 : i32
    %c0_i32_0 = arith.constant 0 : i32
    return %arg1, %c0_i32 : i32, i32
  }
  func.func @transform_4(%arg0: i32, %arg1: i32) -> (i32, i32) {
    %c0_i32 = arith.constant 0 : i32
    %c0_i32_0 = arith.constant 0 : i32
    %c0_i32_1 = arith.constant 0 : i32
    return %c0_i32, %c0_i32_0 : i32, i32
  }
  func.func @transform_5(%arg0: i32, %arg1: i32) -> (i32, i32) {
    %c0_i32 = arith.constant 0 : i32
    %c0_i32_0 = arith.constant 0 : i32
    return %arg0, %c0_i32 : i32, i32
  }
}

</mosaic_0001>

<bundles_post_ra>
// kernel: tpu_custom_call.1
= control target key start
LH: loop header
LB: loop body
LE: loop exit
PB: predicated region body
PF: predicated region fallthrough
CT: control target
= control target key end

     0   :  { %10 = vsyncpa [#allocation4], 0  ;;  %s634_s0 = inlined_call_operand.hbm [shape: f32[16,128], index: 0, kind: input, shape index: {}]   ;;  %s635_s1 = inlined_call_operand.hbm [shape: bf16[128,128], index: 1, kind: input, shape index: {}]   ;;  %s636_s2 = inlined_call_operand.vmem [shape: f32[1,128], index: 2, kind: input, shape index: {}]   ;;  %s637_s3 = inlined_call_operand.hbm [shape: bf16[128,128], index: 3, kind: input, shape index: {}]   ;;  %s638_s4 = inlined_call_operand.vmem [shape: f32[1,128], index: 4, kind: input, shape index: {}]   ;;  %s639_s5 = inlined_call_operand.hbm [shape: f32[16,128], index: 5, kind: output, shape index: {}]  }
   0x1   :  { %11 = vsyncpa [#allocation7], 0 }
   0x2   :  { %12 = vsyncpa [#allocation5], 0  ;;  %s528_s18 = smov [#allocation6]   ;;  %s434_s22 = scalar_lea.hbm %s635_s1, 1024 }
   0x3   :  { %s30_s19 = sshll.u32 %s528_s18, 4  ;;  %p435_p0 = scmp.ne.s32.totalorder %s635_s1, %s434_s22  ;;  %s31_s19 = int_to_ptr.vmem [resolvable:$true] %s30_s19 }
   0x4   :  { %p438_p1 = scmp.lt.u32.totalorder %s434_s22, %s635_s1 }
   0x6   :  { %p440_p2 = pnand %p438_p1, %p435_p0 }
   0x8   :  { %443 = shalt.err (!%p440_p2)
}
   0x9   :  { %s444_s27 = scalar_lea.vmem %s31_s19, 1024  ;;  %p449_p4 = scmp.lt.s32.totalorder %s31_s19, %s31_s19 }
   0xa   :  { %p445_p3 = scmp.ne.s32.totalorder %s31_s19, %s444_s27  ;;  %p450_p5 = scmp.lt.s32.totalorder %s444_s27, %s444_s27 }
   0xc   :  { %p451_p6 = por %p450_p5, %p449_p4 }
   0xe   :  { %p452_p7 = pnand %p451_p6, %p445_p3 }
  0x10   :  { %455 = shalt.err (!%p452_p7)
}
  0x11   :  { %s529_s28 = smov 64   ;;  %s530_s29 = smov 4  }
  0x12   :  { %36 = dma.hbm_to_vmem [thread:$0]  %s635_s1, 1024, %s31_s19, [#allocation7], %s529_s28, %s529_s28, %s530_s29  }
  0x13   :  { %s531_s7 = smov [#allocation3]   ;;  %s456_s11 = scalar_lea.hbm %s634_s0, 256 }
  0x14   :  { %s18_s8 = sshll.u32 %s531_s7, 4  ;;  %p457_p8 = scmp.ne.s32.totalorder %s634_s0, %s456_s11  ;;  %s19_s8 = int_to_ptr.vmem [resolvable:$true] %s18_s8 }
  0x15   :  { %p460_p9 = scmp.lt.u32.totalorder %s456_s11, %s634_s0 }
  0x17   :  { %p462_p10 = pnand %p460_p9, %p457_p8 }
  0x19   :  { %465 = shalt.err (!%p462_p10)
}
  0x1a   :  { %s466_s16 = scalar_lea.vmem %s19_s8, 256  ;;  %p471_p12 = scmp.lt.s32.totalorder %s19_s8, %s19_s8 }
  0x1b   :  { %p467_p11 = scmp.ne.s32.totalorder %s19_s8, %s466_s16  ;;  %p472_p13 = scmp.lt.s32.totalorder %s466_s16, %s466_s16 }
  0x1d   :  { %p473_p0 = por %p472_p13, %p471_p12 }
  0x1f   :  { %p474_p1 = pnand %p473_p0, %p467_p11 }
  0x21   :  { %477 = shalt.err (!%p474_p1)
}
  0x22   :  { %s532_s1 = smov 128   ;;  %s533_s17 = smov 8  }
  0x23   :  { %24 = dma.hbm_to_vmem [thread:$0]  %s634_s0, 256, %s19_s8, [#allocation4], %s532_s1, %s532_s1, %s533_s17  }
  0x24   :  { %s534_s20 = smov [#allocation8]   ;;  %s478_s24 = scalar_lea.hbm %s637_s3, 1024 }
  0x25   :  { %s44_s21 = sshll.u32 %s534_s20, 4  ;;  %p479_p2 = scmp.ne.s32.totalorder %s637_s3, %s478_s24  ;;  %s45_s21 = int_to_ptr.vmem [resolvable:$true] %s44_s21 }
  0x26   :  { %p482_p3 = scmp.lt.u32.totalorder %s478_s24, %s637_s3 }
  0x28   :  { %p484_p4 = pnand %p482_p3, %p479_p2 }
  0x2a   :  { %487 = shalt.err (!%p484_p4)
}
  0x2b   :  { %s488_s6 = scalar_lea.vmem %s45_s21, 1024  ;;  %p493_p6 = scmp.lt.s32.totalorder %s45_s21, %s45_s21 }
  0x2c   :  { %p489_p5 = scmp.ne.s32.totalorder %s45_s21, %s488_s6  ;;  %p494_p7 = scmp.lt.s32.totalorder %s488_s6, %s488_s6 }
  0x2e   :  { %p495_p8 = por %p494_p7, %p493_p6 }
  0x30   :  { %p496_p9 = pnand %p495_p8, %p489_p5 }
  0x32   :  { %499 = shalt.err (!%p496_p9)
}
  0x33   :  { %50 = dma.hbm_to_vmem [thread:$0]  %s637_s3, 1024, %s45_s21, [#allocation7], %s529_s28, %s529_s28, %s530_s29  }
  0x34   :  { %522 = dma.done.wait [#allocation4], 256  }
  0x35   :  { %523 = vsyncadd [#allocation4], 4294967040 }
  0x36   :  { %524 = dma.done.wait [#allocation7], 2048  }
  0x37   :  { %525 = vsyncadd [#allocation7], 4294965248  ;;  %v535_v0 = vmov 0.0   ;;  %vm536_vm0 = vmmov 0   ;;  %v418_v1 = vld [vmem:[#allocation6] sm:$0xff]   ;;  %v419_v2 = vld [vmem:[#allocation6 + $0x8] sm:$0xff]  }
  0x38   :  { %368 = vmatprep.subr.bf16.mxu0 %v535_v0  ;;  %384 = vmatprep.mubr.msk.bf16.mxu0 %vm536_vm0, %v535_v0  ;;  %v420_v3 = vld [vmem:[#allocation6 + $0x10] sm:$0xff]   ;;  %v426_v4 = vld [vmem:[#allocation8] sm:$0xff]   ;;  %v421_v5 = vld [vmem:[#allocation6 + $0x18] sm:$0xff]   ;;  %s537_s9 = smov [#allocation9]  }
  0x39   :  { %388 = vmatprep.subr.bf16.mxu1 %v535_v0  ;;  %404 = vmatprep.mubr.msk.bf16.mxu1 %vm536_vm0, %v535_v0  ;;  %v427_v6 = vld [vmem:[#allocation8 + $0x8] sm:$0xff]   ;;  %v422_v7 = vld [vmem:[#allocation6 + $0x20] sm:$0xff]   ;;  %v428_v8 = vld [vmem:[#allocation8 + $0x10] sm:$0xff]   ;;  %s319_s10 = sshll.u32 %s537_s9, 4  ;;  %s320_s10 = int_to_ptr.vmem [resolvable:$true] %s319_s10 }
  0x3a   :  { %369 = vmatpush3.bf16.msra.mxu0 %v418_v1  ;;  %389 = vmatpush3.bf16.msra.mxu1 %v426_v4  ;;  %v423_v9 = vld [vmem:[#allocation6 + $0x28] sm:$0xff]   ;;  %v429_v10 = vld [vmem:[#allocation8 + $0x18] sm:$0xff]   ;;  %v424_v11 = vld [vmem:[#allocation6 + $0x30] sm:$0xff]   ;;  %p505_p11 = scmp.lt.s32.totalorder %s320_s10, %s320_s10 }
  0x3b   :  { %370 = vmatprep.subr.bf16.mxu0 %v535_v0  ;;  %390 = vmatprep.subr.bf16.mxu1 %v535_v0  ;;  %v430_v12 = vld [vmem:[#allocation8 + $0x20] sm:$0xff]   ;;  %v425_v13 = vld [vmem:[#allocation6 + $0x38] sm:$0xff]   ;;  %v69_v14 = vld [vmem:[#allocation3] sm:$0xff] }
  0x3c   :  { %v70_v15 = vld [vmem:[#allocation3 + $0x8] sm:$0xff]  ;;  %v431_v16 = vld [vmem:[#allocation8 + $0x28] sm:$0xff]   ;;  %v432_v18 = vld [vmem:[#allocation8 + $0x30] sm:$0xff]  }
  0x3d   :  { %v71_v17 = vpack.c.bf16 %v70_v15, %v69_v14  ;;  %v433_v19 = vld [vmem:[#allocation8 + $0x38] sm:$0xff]   ;;  %v332_v20 = vld [vmem:[%s636_s2] ss:$0 sm:$0xff]  ;;  %s500_s2 = scalar_lea.vmem %s320_s10, 256 }
  0x3e   :  { %371 = vmatpush3.bf16.msra.mxu0 %v419_v2  ;;  %391 = vmatpush3.bf16.msra.mxu1 %v427_v6  ;;  %v349_v30 = vld [vmem:[%s638_s4] ss:$0 sm:$0xff]  ;;  %p501_p10 = scmp.ne.s32.totalorder %s320_s10, %s500_s2  ;;  %p506_p12 = scmp.lt.s32.totalorder %s500_s2, %s500_s2 }
  0x3f   :  { %372 = vmatprep.subr.bf16.mxu0 %v535_v0  ;;  %392 = vmatprep.subr.bf16.mxu1 %v535_v0 }
  0x40   :  { %p507_p13 = por %p506_p12, %p505_p11 }
  0x42   :  { %373 = vmatpush3.bf16.msra.mxu0 %v420_v3  ;;  %393 = vmatpush3.bf16.msra.mxu1 %v428_v8  ;;  %p508_p0 = pnand %p507_p13, %p501_p10 }
  0x43   :  { %374 = vmatprep.subr.bf16.mxu0 %v535_v0  ;;  %394 = vmatprep.subr.bf16.mxu1 %v535_v0 }
  0x46   :  { %375 = vmatpush3.bf16.msra.mxu0 %v421_v5  ;;  %395 = vmatpush3.bf16.msra.mxu1 %v429_v10 }
  0x47   :  { %376 = vmatprep.subr.bf16.mxu0 %v535_v0  ;;  %396 = vmatprep.subr.bf16.mxu1 %v535_v0 }
  0x4a   :  { %377 = vmatpush3.bf16.msra.mxu0 %v422_v7  ;;  %397 = vmatpush3.bf16.msra.mxu1 %v430_v12 }
  0x4b   :  { %378 = vmatprep.subr.bf16.mxu0 %v535_v0  ;;  %398 = vmatprep.subr.bf16.mxu1 %v535_v0 }
  0x4e   :  { %379 = vmatpush3.bf16.msra.mxu0 %v423_v9  ;;  %399 = vmatpush3.bf16.msra.mxu1 %v431_v16 }
  0x4f   :  { %380 = vmatprep.subr.bf16.mxu0 %v535_v0  ;;  %400 = vmatprep.subr.bf16.mxu1 %v535_v0 }
  0x52   :  { %381 = vmatpush3.bf16.msra.mxu0 %v424_v11  ;;  %401 = vmatpush3.bf16.msra.mxu1 %v432_v18 }
  0x53   :  { %382 = vmatprep.subr.bf16.mxu0 %v535_v0  ;;  %402 = vmatprep.subr.bf16.mxu1 %v535_v0 }
  0x56   :  { %383 = vmatpush3.bf16.msra.mxu0 %v425_v13  ;;  %403 = vmatpush3.bf16.msra.mxu1 %v433_v19 }
  0x59   :  { %385 = vmatmul.mubr.bf16.vlgmr.msra.gmra.mrb[0].mxu0 %v71_v17 }
 0x12c   :  { %v177_v21 = vpop.f32.mrb[0].mxu0 }
 0x12d   :  { %v178_v22 = vadd.f32 %v332_v20, %v177_v21  ;;  %v386_v23 = vpop.f32.mrb[1].mxu0 }
 0x12e   :  { %v180_v24 = vpop.f32.mrb[2].mxu0 }
 0x12f   :  { %v181_v25 = vadd.f32 %v332_v20, %v180_v24  ;;  %v387_v26 = vpop.f32.mrb[3].mxu0  ;;  %v184_v27 = vmax.f32 %v178_v22, 0.0 }
 0x131   :  { %v185_v28 = vmax.f32 %v181_v25, 0.0 }
 0x133   :  { %v188_v29 = vpack.c.bf16 %v185_v28, %v184_v27 }
 0x135   :  { %405 = vmatmul.mubr.bf16.vlgmr.msra.gmra.mrb[0].mxu1 %v188_v29 }
 0x208   :  { %v287_v31 = vpop.f32.mrb[0].mxu1 }
 0x209   :  { %v310_v32 = vadd.f32 %v349_v30, %v287_v31  ;;  %v406_v33 = vpop.f32.mrb[1].mxu1 }
 0x20a   :  { %v290_v34 = vpop.f32.mrb[2].mxu1 }
 0x20b   :  { %312 = vst [vmem:[#allocation9] sm:$0xff] %v310_v32  ;;  %v311_v35 = vadd.f32 %v349_v30, %v290_v34  ;;  %v407_v36 = vpop.f32.mrb[3].mxu1 }
 0x20d   :  { %313 = vst [vmem:[#allocation9 + $0x8] sm:$0xff] %v311_v35 }
 0x20e   :  { %511 = shalt.err (!%p508_p0)
}
 0x20f   :  { %s512_s12 = scalar_lea.hbm %s639_s5, 256 }
 0x210   :  { %p513_p1 = scmp.ne.s32.totalorder %s639_s5, %s512_s12  ;;  %p516_p2 = scmp.lt.u32.totalorder %s512_s12, %s639_s5 }
 0x212   :  { %p518_p3 = pnand %p516_p2, %p513_p1 }
 0x214   :  { %521 = shalt.err (!%p518_p3)
}
 0x215   :  { %325 = dma.vmem_to_hbm [thread:$0]  %s320_s10, 256, %s639_s5, [#allocation5], %s532_s1, %s532_s1, %s533_s17  }
 0x216   :  { %526 = dma.done.wait [#allocation5], 256  }
 0x217   :  { %527 = vsyncadd [#allocation5], 4294967040 }
 0x218   :  { %329 = vsyncpa [#allocation4], 1 }
 0x219   :  { %330 = vsyncpa [#allocation7], 1 }
 0x21a   :  { %331 = vsyncpa [#allocation5], 1 }

</bundles_post_ra>
